<compile_context>
chip_gen: v5e
topology: v5e:2x2
jax: 0.10.0
libtpu: 0.0.40
codegen_flags: <defaults>
</compile_context>

<pallas_src>
import jax
import jax.numpy as jnp
from jax.experimental import pallas as pl
from jax.experimental.pallas import tpu as pltpu

LANE = 128  # vreg lane width; every feature axis is zero-padded to this


def _make_kernel(num_layers):
    """Kernel for num_layers = num_hidden + 1 packed Linear layers.

    Layers 0..num_layers-2 are BN-folded hidden layers (matmul + bias + ReLU),
    the last layer is the final Linear(., 1) zero-padded to 128 output lanes.
    """

    def kernel(x_ref, w_ref, b_ref, out_ref):
        # x_ref  : (TB, DP)     bf16  activation tile (batch on sublanes, features on lanes)
        # w_ref  : (L, DP, DP)  bf16  packed weights, VMEM-resident across batch tiles
        # b_ref  : (L, 1, DP)   f32   packed biases,  VMEM-resident
        # out_ref: (TB, DP)     f32   lane-dense output block; real result lives in lane 0
        h = x_ref[...]  # bf16, feeds the MXU directly
        for i in range(num_layers):
            z = jnp.dot(h, w_ref[i], preferred_element_type=jnp.float32) + b_ref[i]
            if i < num_layers - 1:
                # BN(eval) is folded into w/b; Dropout(eval) is identity.
                # bias-add/ReLU in f32, single f32->bf16 cast per layer for the MXU.
                h = jnp.maximum(z, 0.0).astype(jnp.bfloat16)
            else:
                out_ref[...] = z

    return kernel


def init_params(key, input_dim, hidden_dims, dp=LANE):
    """Xavier-uniform Linears, zero biases, BatchNorm1d (eval stats) folded in.

    Returns 2 packed operands (L = len(hidden_dims) + 1):
      w_slab : (L, dp, dp) bf16  zero-padded; BN scale folded into hidden columns;
                                 slot L-1 holds the final Linear(.,1) weight in lane 0.
      b_slab : (L, 1, dp)  f32   zero-padded; BN shift folded in; slot L-1 lane 0 is b_last.
    """
    eps = 1e-5
    dims = [input_dim] + list(hidden_dims)
    num_hidden = len(hidden_dims)
    num_layers = num_hidden + 1
    assert num_hidden >= 1 and max(dims) <= dp

    w_slab = jnp.zeros((num_layers, dp, dp), jnp.float32)
    b_slab = jnp.zeros((num_layers, 1, dp), jnp.float32)

    for i, (din, dout) in enumerate(zip(dims[:-1], dims[1:])):
        key, sub = jax.random.split(key)
        limit = (6.0 / (din + dout)) ** 0.5                       # xavier_uniform_
        w = jax.random.uniform(sub, (din, dout), jnp.float32, -limit, limit)
        b = jnp.zeros((dout,), jnp.float32)
        # BatchNorm1d eval: y = (x - running_mean)/sqrt(running_var+eps)*gamma + beta
        running_mean = jnp.zeros((dout,), jnp.float32)
        running_var = jnp.ones((dout,), jnp.float32)
        gamma = jnp.ones((dout,), jnp.float32)
        beta = jnp.zeros((dout,), jnp.float32)
        scale = gamma / jnp.sqrt(running_var + eps)
        w_fold = w * scale[None, :]                               # fold BN into Linear
        b_fold = (b - running_mean) * scale + beta
        w_slab = w_slab.at[i, :din, :dout].set(w_fold)
        b_slab = b_slab.at[i, 0, :dout].set(b_fold)

    # Final Linear(., 1) packed as one more 128-wide layer; real weight in lane 0.
    key, sub = jax.random.split(key)
    din = dims[-1]
    limit = (6.0 / (din + 1)) ** 0.5
    w_last = jax.random.uniform(sub, (din,), jnp.float32, -limit, limit)
    w_slab = w_slab.at[num_hidden, :din, 0].set(w_last)
    b_slab = b_slab.at[num_hidden, 0, 0].set(0.0)                 # zero-init bias

    return w_slab.astype(jnp.bfloat16), b_slab


def gold_price_net_forward(x, params, max_tb=2048):
    """Batch-tiled fused forward. Weights stay VMEM-resident across batch tiles."""
    w_slab, b_slab = params
    num_layers, dp, _ = w_slab.shape
    batch, din = x.shape

    # Batch tile: multiple of 16 (bf16 sublane packing), whole batch when small.
    tb = min(((batch + 15) // 16) * 16, max_tb)
    bp = ((batch + tb - 1) // tb) * tb
    num_tiles = bp // tb

    # Pre-cast/pad activations to bf16 in the wrapper (halves the input DMA).
    x_pad = jnp.zeros((bp, dp), jnp.bfloat16).at[:batch, :din].set(
        x.astype(jnp.bfloat16))

    kernel = _make_kernel(num_layers)
    out = pl.pallas_call(
        kernel,
        out_shape=jax.ShapeDtypeStruct((bp, dp), jnp.float32),
        grid_spec=pltpu.PrefetchScalarGridSpec(
            num_scalar_prefetch=0,
            grid=(num_tiles,),
            in_specs=[
                pl.BlockSpec((tb, dp), lambda i: (i, 0)),               # activation tile
                pl.BlockSpec((num_layers, dp, dp), lambda i: (0, 0, 0)),  # resident weights
                pl.BlockSpec((num_layers, 1, dp), lambda i: (0, 0, 0)),   # resident biases
            ],
            out_specs=pl.BlockSpec((tb, dp), lambda i: (i, 0)),         # lane-dense output
        ),
        compiler_params=pltpu.CompilerParams(
            # Only split across v7x's 2 TensorCores when there are >= 2 real tiles.
            dimension_semantics=("parallel",) if num_tiles >= 2 else ("arbitrary",),
            vmem_limit_bytes=32 * 1024 * 1024,
        ),
    )(x_pad, w_slab, b_slab)
    return out[:batch, 0:1]


def _reference_forward(x, params):
    """Plain-JAX reference using the same packed/folded bf16 params."""
    w_slab, b_slab = params
    num_layers, dp, _ = w_slab.shape
    batch, din = x.shape
    h = jnp.zeros((batch, dp), jnp.bfloat16).at[:, :din].set(x.astype(jnp.bfloat16))
    for i in range(num_layers):
        z = jnp.dot(h, w_slab[i], preferred_element_type=jnp.float32) + b_slab[i]
        if i < num_layers - 1:
            h = jnp.maximum(z, 0.0).astype(jnp.bfloat16)
        else:
            out = z
    return out[:, 0:1]


if __name__ == "__main__":
    key = jax.random.PRNGKey(0)
    batch, input_dim, hidden_dims = 16, 16, (32, 32)

    k_x, k_p = jax.random.split(key)
    x = jax.random.normal(k_x, (batch, input_dim), jnp.float32)
    params = init_params(k_p, input_dim, hidden_dims)

    out = jax.block_until_ready(gold_price_net_forward(x, params))
    ref = _reference_forward(x, params)

    assert out.shape == (batch, 1)
    assert jnp.allclose(out, ref, atol=1e-4, rtol=1e-4)
    print("KERNEL_OK")
</pallas_src>

<mosaic_0001>
module attributes {stable_mosaic.version = 11 : i64} {
  func.func @kernel(%arg0: i32, %arg1: memref<16x128xbf16, #tpu.memory_space<vmem>>, %arg2: memref<3x128x128xbf16, #tpu.memory_space<vmem>>, %arg3: memref<3x1x128xf32, #tpu.memory_space<vmem>>, %arg4: memref<16x128xf32, #tpu.memory_space<vmem>>) attributes {dimension_semantics = [#tpu.dimension_semantics<arbitrary>], iteration_bounds = array<i64: 1>, scalar_prefetch = 0 : i64, scratch_operands = 0 : i64, tpu.core_type = #tpu.core_type<tc>, window_params = [{transform_indices = @transform_0, window_bounds = array<i64: 16, 128>}, {pipeline_mode = #tpu.pipeline_mode<synchronous>, transform_indices = @transform_1, window_bounds = array<i64: 3, 128, 128>}, {pipeline_mode = #tpu.pipeline_mode<synchronous>, transform_indices = @transform_2, window_bounds = array<i64: 3, 1, 128>}, {transform_indices = @transform_3, window_bounds = array<i64: 16, 128>}]} {
    %c0 = arith.constant 0 : index
    %c0_0 = arith.constant 0 : index
    %0 = vector.load %arg1[%c0, %c0_0] : memref<16x128xbf16, #tpu.memory_space<vmem>>, vector<16x128xbf16>
    %c0_1 = arith.constant 0 : index
    %c0_2 = arith.constant 0 : index
    %c0_3 = arith.constant 0 : index
    %1 = vector.load %arg2[%c0_1, %c0_2, %c0_3] : memref<3x128x128xbf16, #tpu.memory_space<vmem>>, vector<1x128x128xbf16>
    %2 = vector.shape_cast %1 : vector<1x128x128xbf16> to vector<128x128xbf16>
    %cst = arith.constant dense<0.000000e+00> : vector<16x128xf32>
    %3 = tpu.matmul %0, %2, %cst {dimension_numbers = #tpu.dot_dimension_numbers<[1], [0], [0], [1], [0, 0, 1, 1], [], []>} : vector<16x128xbf16>, vector<128x128xbf16>, vector<16x128xf32> -> vector<16x128xf32>
    %c0_4 = arith.constant 0 : index
    %c0_5 = arith.constant 0 : index
    %c0_6 = arith.constant 0 : index
    %4 = vector.load %arg3[%c0_4, %c0_5, %c0_6] : memref<3x1x128xf32, #tpu.memory_space<vmem>>, vector<1x1x128xf32>
    %5 = vector.shape_cast %4 : vector<1x1x128xf32> to vector<1x128xf32>
    %6 = vector.broadcast %5 : vector<1x128xf32> to vector<16x128xf32>
    %7 = arith.addf %3, %6 : vector<16x128xf32>
    %cst_7 = arith.constant 0.000000e+00 : f32
    %8 = vector.broadcast %cst_7 : f32 to vector<16x128xf32>
    %9 = arith.maximumf %7, %8 : vector<16x128xf32>
    %10 = arith.truncf %9 : vector<16x128xf32> to vector<16x128xbf16>
    %c1 = arith.constant 1 : index
    %c0_8 = arith.constant 0 : index
    %c0_9 = arith.constant 0 : index
    %11 = vector.load %arg2[%c1, %c0_8, %c0_9] : memref<3x128x128xbf16, #tpu.memory_space<vmem>>, vector<1x128x128xbf16>
    %12 = vector.shape_cast %11 : vector<1x128x128xbf16> to vector<128x128xbf16>
    %cst_10 = arith.constant dense<0.000000e+00> : vector<16x128xf32>
    %13 = tpu.matmul %10, %12, %cst_10 {dimension_numbers = #tpu.dot_dimension_numbers<[1], [0], [0], [1], [0, 0, 1, 1], [], []>} : vector<16x128xbf16>, vector<128x128xbf16>, vector<16x128xf32> -> vector<16x128xf32>
    %c1_11 = arith.constant 1 : index
    %c0_12 = arith.constant 0 : index
    %c0_13 = arith.constant 0 : index
    %14 = vector.load %arg3[%c1_11, %c0_12, %c0_13] : memref<3x1x128xf32, #tpu.memory_space<vmem>>, vector<1x1x128xf32>
    %15 = vector.shape_cast %14 : vector<1x1x128xf32> to vector<1x128xf32>
    %16 = vector.broadcast %15 : vector<1x128xf32> to vector<16x128xf32>
    %17 = arith.addf %13, %16 : vector<16x128xf32>
    %cst_14 = arith.constant 0.000000e+00 : f32
    %18 = vector.broadcast %cst_14 : f32 to vector<16x128xf32>
    %19 = arith.maximumf %17, %18 : vector<16x128xf32>
    %20 = arith.truncf %19 : vector<16x128xf32> to vector<16x128xbf16>
    %c2 = arith.constant 2 : index
    %c0_15 = arith.constant 0 : index
    %c0_16 = arith.constant 0 : index
    %21 = vector.load %arg2[%c2, %c0_15, %c0_16] : memref<3x128x128xbf16, #tpu.memory_space<vmem>>, vector<1x128x128xbf16>
    %22 = vector.shape_cast %21 : vector<1x128x128xbf16> to vector<128x128xbf16>
    %cst_17 = arith.constant dense<0.000000e+00> : vector<16x128xf32>
    %23 = tpu.matmul %20, %22, %cst_17 {dimension_numbers = #tpu.dot_dimension_numbers<[1], [0], [0], [1], [0, 0, 1, 1], [], []>} : vector<16x128xbf16>, vector<128x128xbf16>, vector<16x128xf32> -> vector<16x128xf32>
    %c2_18 = arith.constant 2 : index
    %c0_19 = arith.constant 0 : index
    %c0_20 = arith.constant 0 : index
    %24 = vector.load %arg3[%c2_18, %c0_19, %c0_20] : memref<3x1x128xf32, #tpu.memory_space<vmem>>, vector<1x1x128xf32>
    %25 = vector.shape_cast %24 : vector<1x1x128xf32> to vector<1x128xf32>
    %26 = vector.broadcast %25 : vector<1x128xf32> to vector<16x128xf32>
    %27 = arith.addf %23, %26 : vector<16x128xf32>
    %c0_21 = arith.constant 0 : index
    %c0_22 = arith.constant 0 : index
    %28 = vector.load %arg4[%c0_21, %c0_22] : memref<16x128xf32, #tpu.memory_space<vmem>>, vector<16x128xf32>
    tpu.vector_store %arg4[%c0_21, %c0_22], %27 {strides = array<i32>} : memref<16x128xf32, #tpu.memory_space<vmem>>, vector<16x128xf32>,
    return
  }
  func.func @transform_0(%arg0: i32) -> (i32, i32) {
    %c0_i32 = arith.constant 0 : i32
    %c0_i32_0 = arith.constant 0 : i32
    return %arg0, %c0_i32 : i32, i32
  }
  func.func @transform_1(%arg0: i32) -> (i32, i32, i32) {
    %c0_i32 = arith.constant 0 : i32
    %c0_i32_0 = arith.constant 0 : i32
    %c0_i32_1 = arith.constant 0 : i32
    %c0_i32_2 = arith.constant 0 : i32
    return %c0_i32, %c0_i32_0, %c0_i32_1 : i32, i32, i32
  }
  func.func @transform_2(%arg0: i32) -> (i32, i32, i32) {
    %c0_i32 = arith.constant 0 : i32
    %c0_i32_0 = arith.constant 0 : i32
    %c0_i32_1 = arith.constant 0 : i32
    %c0_i32_2 = arith.constant 0 : i32
    return %c0_i32, %c0_i32_0, %c0_i32_1 : i32, i32, i32
  }
  func.func @transform_3(%arg0: i32) -> (i32, i32) {
    %c0_i32 = arith.constant 0 : i32
    %c0_i32_0 = arith.constant 0 : i32
    return %arg0, %c0_i32 : i32, i32
  }
}

</mosaic_0001>

<bundles_post_ra>
// kernel: tpu_custom_call.1
= control target key start
LH: loop header
LB: loop body
LE: loop exit
PB: predicated region body
PF: predicated region fallthrough
CT: control target
= control target key end

     0   :  { %8 = vsyncpa [#allocation3], 0  ;;  %s630_s0 = inlined_call_operand.hbm [shape: bf16[16,128], index: 0, kind: input, shape index: {}]   ;;  %s631_s1 = inlined_call_operand.hbm [shape: bf16[3,128,128], index: 1, kind: input, shape index: {}]   ;;  %s632_s2 = inlined_call_operand.hbm [shape: f32[3,1,128], index: 2, kind: input, shape index: {}]   ;;  %s633_s3 = inlined_call_operand.hbm [shape: f32[16,128], index: 3, kind: output, shape index: {}]  }
   0x1   :  { %9 = vsyncpa [#allocation6], 0 }
   0x2   :  { %10 = vsyncpa [#allocation4], 0  ;;  %s28_s14 = sshll.u32 %s631_s1, 4  ;;  %s588_s15 = smov [#allocation5]   ;;  %s29_s14 = int_to_ptr.hbm [resolvable:$true] %s28_s14 }
   0x3   :  { %s30_s16 = sshll.u32 %s588_s15, 4  ;;  %s15_s19 = sshll.u32 %s630_s0, 4  ;;  %s31_s16 = int_to_ptr.vmem [resolvable:$true] %s30_s16  ;;  %s16_s19 = int_to_ptr.hbm [resolvable:$true] %s15_s19 }
   0x4   :  { %s589_s20 = smov 64   ;;  %s590_s21 = smov 4  }
   0x5   :  { %36 = dma.hbm_to_vmem [thread:$0]  %s29_s14, 3072, %s31_s16, [#allocation6], %s589_s20, %s589_s20, %s590_s21  }
   0x6   :  { %s591_s22 = smov [#allocation2]   ;;  %s41_s26 = sshll.u32 %s632_s2, 4  ;;  %s42_s26 = int_to_ptr.hbm [resolvable:$true] %s41_s26 }
   0x7   :  { %s17_s23 = sshll.u32 %s591_s22, 4  ;;  %s592_s1 = smov [#allocation7]   ;;  %s18_s23 = int_to_ptr.vmem [resolvable:$true] %s17_s23 }
   0x8   :  { %23 = dma.hbm_to_vmem [thread:$0]  %s16_s19, 128, %s18_s23, [#allocation3], %s589_s20, %s589_s20, %s590_s21  }
   0x9   :  { %s43_s27 = sshll.u32 %s592_s1, 4  ;;  %s593_s28 = smov 16   ;;  %s44_s27 = int_to_ptr.vmem [resolvable:$true] %s43_s27 }
   0xa   :  { %s594_s29 = smov 1  }
   0xb   :  { %49 = dma.hbm_to_vmem [thread:$0]  %s42_s26, 48, %s44_s27, [#allocation6], %s593_s28, %s593_s28, %s594_s29  }
   0xc   :  { %582 = dma.done.wait [#allocation3], 128  }
   0xd   :  { %583 = vsyncadd [#allocation3], 4294967168 }
   0xe   :  { %584 = dma.done.wait [#allocation6], 3120  }
   0xf   :  { %585 = vsyncadd [#allocation6], 4294964176  ;;  %v456_v0 = vld [vmem:[#allocation5 + $0x38] sm:$0xff]  ;;  %v455_v1 = vld [vmem:[#allocation5 + $0x30] sm:$0xff]  ;;  %s595_s0 = smov [#allocation8]   ;;  %s334_s5 = sshll.u32 %s633_s3, 4  ;;  %s335_s5 = int_to_ptr.hbm [resolvable:$true] %s334_s5 }
  0x10   :  { %138 = vmatpush.bf16.msra.mxu0 %v456_v0  ;;  %v464_v2 = vld [vmem:[#allocation5 + $0x78] sm:$0xff]  ;;  %v463_v3 = vld [vmem:[#allocation5 + $0x70] sm:$0xff]  ;;  %v454_v4 = vld [vmem:[#allocation5 + $0x28] sm:$0xff]  ;;  %s332_s2 = sshll.u32 %s595_s0, 4  ;;  %s596_s6 = smov 128   ;;  %s333_s2 = int_to_ptr.vmem [resolvable:$true] %s332_s2 }
  0x11   :  { %225 = vmatpush.bf16.msra.mxu1 %v464_v2  ;;  %v462_v5 = vld [vmem:[#allocation5 + $0x68] sm:$0xff]  ;;  %v453_v6 = vld [vmem:[#allocation5 + $0x20] sm:$0xff]  ;;  %v452_v8 = vld [vmem:[#allocation5 + $0x18] sm:$0xff]  ;;  %s597_s7 = smov 8  }
  0x12   :  { %v461_v7 = vld [vmem:[#allocation5 + $0x60] sm:$0xff]  ;;  %v451_v9 = vld [vmem:[#allocation5 + $0x10] sm:$0xff]  ;;  %v450_v10 = vld [vmem:[#allocation5 + $0x8] sm:$0xff] }
  0x13   :  { %v449_v11 = vld [vmem:[#allocation5] sm:$0xff]  ;;  %v448_v12 = vld [vmem:[#allocation2] sm:$0xff]  ;;  %v459_v14 = vld [vmem:[#allocation5 + $0x50] sm:$0xff] }
  0x14   :  { %139 = vmatpush.bf16.msra.mxu0 %v455_v1  ;;  %v460_v13 = vld [vmem:[#allocation5 + $0x58] sm:$0xff]  ;;  %v458_v15 = vld [vmem:[#allocation5 + $0x48] sm:$0xff]  ;;  %v457_v16 = vld [vmem:[#allocation5 + $0x40] sm:$0xff] }
  0x15   :  { %226 = vmatpush.bf16.msra.mxu1 %v463_v3  ;;  %v472_v17 = vld [vmem:[#allocation5 + $0xb8] sm:$0xff]  ;;  %v471_v18 = vld [vmem:[#allocation5 + $0xb0] sm:$0xff]  ;;  %v470_v19 = vld [vmem:[#allocation5 + $0xa8] sm:$0xff] }
  0x16   :  { %312 = vmatpush.bf16.msra.mxu2 %v472_v17  ;;  %v469_v20 = vld [vmem:[#allocation5 + $0xa0] sm:$0xff]  ;;  %v468_v29 = vld [vmem:[#allocation5 + $0x98] sm:$0xff]  ;;  %v467_v30 = vld [vmem:[#allocation5 + $0x90] sm:$0xff] }
  0x17   :  { %v483_v22 = vld [vmem:[#allocation7] ss:$0 sm:$0xff]  ;;  %v466_v31 = vld [vmem:[#allocation5 + $0x88] sm:$0xff]  ;;  %v484_v34 = vld [vmem:[#allocation7 + $0x1] ss:$0 sm:$0xff] }
  0x18   :  { %140 = vmatpush.bf16.msra.mxu0 %v454_v4  ;;  %v465_v32 = vld [vmem:[#allocation5 + $0x80] sm:$0xff] }
  0x19   :  { %227 = vmatpush.bf16.msra.mxu1 %v462_v5  ;;  %v485_v41 = vld [vmem:[#allocation7 + $0x2] ss:$0 sm:$0xff] }
  0x1a   :  { %313 = vmatpush.bf16.msra.mxu2 %v471_v18 }
  0x1c   :  { %141 = vmatpush.bf16.msra.mxu0 %v453_v6 }
  0x1d   :  { %228 = vmatpush.bf16.msra.mxu1 %v461_v7 }
  0x1e   :  { %314 = vmatpush.bf16.msra.mxu2 %v470_v19 }
  0x20   :  { %142 = vmatpush.bf16.msra.mxu0 %v452_v8 }
  0x21   :  { %229 = vmatpush.bf16.msra.mxu1 %v460_v13 }
  0x22   :  { %315 = vmatpush.bf16.msra.mxu2 %v469_v20 }
  0x24   :  { %143 = vmatpush.bf16.msra.mxu0 %v451_v9 }
  0x25   :  { %230 = vmatpush.bf16.msra.mxu1 %v459_v14 }
  0x26   :  { %316 = vmatpush.bf16.msra.mxu2 %v468_v29 }
  0x28   :  { %144 = vmatpush.bf16.msra.mxu0 %v450_v10 }
  0x29   :  { %231 = vmatpush.bf16.msra.mxu1 %v458_v15 }
  0x2a   :  { %317 = vmatpush.bf16.msra.mxu2 %v467_v30 }
  0x2c   :  { %145 = vmatpush.bf16.msra.mxu0 %v449_v11 }
  0x2d   :  { %232 = vmatpush.bf16.msra.mxu1 %v457_v16 }
  0x2e   :  { %318 = vmatpush.bf16.msra.mxu2 %v466_v31 }
  0x2f   :  { %146 = vmatmul.bf16.vlgmr.msra.gmra.mxu0 %v448_v12 }
  0x32   :  { %319 = vmatpush.bf16.msra.mxu2 %v465_v32 }
  0xac   :  { %v147_v21 = vpop.f32.mrf.mxu0 }
  0xad   :  { %v148_v23 = vadd.f32 %v483_v22, %v147_v21 }
  0xaf   :  { %v152_v26 = vmax.f32 %v148_v23, 0.0 }
  0xb4   :  { %v149_v24 = vpop.f32.mrf.mxu0 }
  0xb5   :  { %v150_v25 = vadd.f32 %v483_v22, %v149_v24 }
  0xb7   :  { %v153_v27 = vmax.f32 %v150_v25, 0.0 }
  0xb9   :  { %v154_v28 = vpack.c.bf16 %v153_v27, %v152_v26 }
  0xbb   :  { %233 = vmatmul.bf16.vlgmr.msra.gmra.mxu1 %v154_v28 }
 0x138   :  { %v234_v33 = vpop.f32.mrf.mxu1 }
 0x139   :  { %v235_v35 = vadd.f32 %v484_v34, %v234_v33 }
 0x13b   :  { %v239_v38 = vmax.f32 %v235_v35, 0.0 }
 0x140   :  { %v236_v36 = vpop.f32.mrf.mxu1 }
 0x141   :  { %v237_v37 = vadd.f32 %v484_v34, %v236_v36 }
 0x143   :  { %v240_v39 = vmax.f32 %v237_v37, 0.0 }
 0x145   :  { %v241_v40 = vpack.c.bf16 %v240_v39, %v239_v38 }
 0x147   :  { %320 = vmatmul.bf16.vlgmr.msra.gmra.mxu2 %v241_v40 }
 0x1ca   :  { %v321_v42 = vpop.f32.mrf.mxu2 }
 0x1cb   :  { %v322_v43 = vadd.f32 %v485_v41, %v321_v42 }
 0x1cd   :  { %326 = vst [vmem:[#allocation8] sm:$0xff] %v322_v43 }
 0x1d2   :  { %v323_v44 = vpop.f32.mrf.mxu2 }
 0x1d3   :  { %v324_v45 = vadd.f32 %v485_v41, %v323_v44 }
 0x1d5   :  { %327 = vst [vmem:[#allocation8 + $0x8] sm:$0xff] %v324_v45 }
 0x1d6   :  { %340 = dma.vmem_to_hbm [thread:$0]  %s333_s2, 256, %s335_s5, [#allocation4], %s596_s6, %s596_s6, %s597_s7  }
 0x1d7   :  { %586 = dma.done.wait [#allocation4], 256  }
 0x1d8   :  { %587 = vsyncadd [#allocation4], 4294967040 }
 0x1d9   :  { %345 = vsyncpa [#allocation3], 1 }
 0x1da   :  { %346 = vsyncpa [#allocation6], 1 }
 0x1db   :  { %347 = vsyncpa [#allocation4], 1 }

</bundles_post_ra>
